<compile_context>
chip_gen: v5e
topology: v5e:2x2
jax: 0.10.0
libtpu: 0.0.40
codegen_flags: <defaults>
</compile_context>

<pallas_src>
import functools

import jax
import jax.numpy as jnp
from jax import lax
from jax.experimental import pallas as pl
from jax.experimental.pallas import tpu as pltpu


def _round_up(x, m):
    return ((x + m - 1) // m) * m


def _ntp_kernel(ids_ref, s_emb_ref, rhs_ref, mob_ref, out_ref, mob_rows_ref,
                *, n_valid, tm):
    """Computes one (tm, N_pad) output tile.

    ids_ref      : (M_pad,)   int32, SMEM (scalar-prefetched s_ids)
    s_emb_ref    : (tm, H)    compute dtype (bf16 / f32)
    rhs_ref      : (H, N_pad) compute dtype  -- constant block every grid step
    mob_ref      : (V, N_pad) f32            -- constant block every grid step
    out_ref      : (tm, N_pad) f32
    mob_rows_ref : (tm, N_pad) f32 VMEM scratch (gathered mob rows for this tile)
    """
    i = pl.program_id(0)

    # In-kernel embedding gather: mob[s_ids[tile]] -> VMEM scratch (no dense
    # (M, N) pre-gather round-trip through HBM).
    def _gather(j, carry):
        row = ids_ref[i * tm + j]
        mob_rows_ref[pl.ds(j, 1), :] = mob_ref[pl.ds(row, 1), :]
        return carry

    lax.fori_loop(0, tm, _gather, 0)

    # Logits on the MXU: (bf16 x bf16) -> f32 accumulation.
    logits = jnp.dot(s_emb_ref[...], rhs_ref[...],
                     preferred_element_type=jnp.float32)

    # Mask lane-padding columns out of the softmax.
    n_pad = logits.shape[-1]
    if n_pad != n_valid:
        col = lax.broadcasted_iota(jnp.int32, logits.shape, 1)
        logits = jnp.where(col < n_valid, logits, jnp.float32(-1e30))

    # Numerically-stable log-softmax in f32.
    m = jnp.max(logits, axis=-1, keepdims=True)
    shifted = logits - m
    lse = jnp.log(jnp.sum(jnp.exp(shifted), axis=-1, keepdims=True))
    log_probs = shifted - lse

    out_ref[...] = (mob_rows_ref[...] * log_probs).astype(out_ref.dtype)


def next_transition_prediction(s_ids, s_embeddings, all_embeddings, mob,
                               *, tm=256, compute_dtype=jnp.bfloat16):
    """JAX/Pallas equivalent of NextTransitionPrediction.forward.

    s_ids:          (B, S) int32 indices into mob rows
    s_embeddings:   (B, S, H) float32
    all_embeddings: (N, 1, H) float32
    mob:            (V, N) float32 frozen embedding table
    returns p_sd:   (B, S, N) float32
    """
    B, S, H = s_embeddings.shape
    N = all_embeddings.shape[0]
    V = mob.shape[0]
    M = B * S

    # Row tile: fill the MXU M dimension; clamp for small M, pad ragged M.
    tm_eff = min(tm, _round_up(M, 8))
    M_pad = _round_up(M, tm_eff)
    N_pad = _round_up(N, 128)            # lane-dense output stores
    grid = (M_pad // tm_eff,)

    # Glue (plain JAX): flatten, cast, pad.  No dense (M, N) mob pre-gather.
    ids_flat = s_ids.reshape(M).astype(jnp.int32)
    s_emb_flat = s_embeddings.reshape(M, H).astype(compute_dtype)
    rhs = jnp.transpose(all_embeddings.reshape(N, H)).astype(compute_dtype)   # (H, N)
    mob_f32 = mob.astype(jnp.float32)

    if M_pad != M:
        ids_flat = jnp.pad(ids_flat, (0, M_pad - M))            # pad ids stay in-range
        s_emb_flat = jnp.pad(s_emb_flat, ((0, M_pad - M), (0, 0)))
    if N_pad != N:
        rhs = jnp.pad(rhs, ((0, 0), (0, N_pad - N)))
        mob_f32 = jnp.pad(mob_f32, ((0, 0), (0, N_pad - N)))

    cd_bytes = jnp.dtype(compute_dtype).itemsize
    # VMEM budget (worst case: constants counted as double-buffered).
    vmem_bytes = (2 * tm_eff * H * cd_bytes        # s_embedding tiles
                  + 2 * H * N_pad * cd_bytes       # RHS (constant block)
                  + 2 * V * N_pad * 4              # mob table (constant block)
                  + tm_eff * N_pad * 4             # gathered-rows scratch
                  + 2 * tm_eff * N_pad * 4)        # output tiles
    vmem_limit_bytes = int(min(max(vmem_bytes + (2 << 20), 8 << 20), 64 << 20))
    # TODO(synk): for very large N or V the VMEM-resident RHS / mob table no longer
    # fits (especially v7x, 64 MiB VMEM); add an N grid axis with an online
    # (running max/sum) log-softmax instead of keeping the full N extent resident.

    cost = pl.CostEstimate(
        flops=2 * M_pad * N_pad * H,
        transcendentals=M_pad * N_pad,
        bytes_accessed=(M_pad * H * cd_bytes + H * N_pad * cd_bytes
                        + V * N_pad * 4 + M_pad * 4 + M_pad * N_pad * 4),
    )

    kernel = functools.partial(_ntp_kernel, n_valid=N, tm=tm_eff)

    out = pl.pallas_call(
        kernel,
        out_shape=jax.ShapeDtypeStruct((M_pad, N_pad), jnp.float32),
        grid_spec=pltpu.PrefetchScalarGridSpec(
            num_scalar_prefetch=1,                                 # s_ids -> SMEM
            grid=grid,
            in_specs=[
                pl.BlockSpec((tm_eff, H), lambda i, ids: (i, 0)),   # s_embeddings tile
                pl.BlockSpec((H, N_pad), lambda i, ids: (0, 0)),    # RHS, constant block
                pl.BlockSpec((V, N_pad), lambda i, ids: (0, 0)),    # mob table, constant block
            ],
            out_specs=pl.BlockSpec((tm_eff, N_pad), lambda i, ids: (i, 0)),
            scratch_shapes=[pltpu.VMEM((tm_eff, N_pad), jnp.float32)],
        ),
        compiler_params=pltpu.CompilerParams(
            dimension_semantics=("parallel",),
            vmem_limit_bytes=vmem_limit_bytes,
        ),
        cost_estimate=cost,
    )(ids_flat, s_emb_flat, rhs, mob_f32)

    return out[:M, :N].reshape(B, S, N)


def _reference(s_ids, s_embeddings, all_embeddings, mob, compute_dtype=jnp.float32):
    a = s_embeddings.astype(compute_dtype)
    b = jnp.squeeze(all_embeddings, -2).astype(compute_dtype)
    s2d = jnp.einsum("bsh,nh->bsn", a, b, preferred_element_type=jnp.float32)
    s2d_mob = jnp.take(mob.astype(jnp.float32), s_ids, axis=0)
    return s2d_mob * jax.nn.log_softmax(s2d, axis=-1)


if __name__ == "__main__":
    # Small deterministic shapes consistent with the module's forward.
    # M = B*S is deliberately not a multiple of 8 and N not a multiple of 128,
    # to exercise the row/lane padding paths.
    B, S, H, N, V = 2, 7, 32, 48, 64

    key = jax.random.PRNGKey(0)
    k1, k2, k3, k4 = jax.random.split(key, 4)

    s_ids = jax.random.randint(k1, (B, S), 0, V, dtype=jnp.int32)
    s_embeddings = jax.random.normal(k2, (B, S, H), dtype=jnp.float32)
    all_embeddings = jax.random.normal(k3, (N, 1, H), dtype=jnp.float32)
    mob = jax.random.uniform(k4, (V, N), dtype=jnp.float32)   # frozen mob_weight table

    # Default (perf) path: bf16 MXU operands, f32 accumulation.
    p_sd = next_transition_prediction(s_ids, s_embeddings, all_embeddings, mob)
    p_sd = jax.block_until_ready(p_sd)
    assert p_sd.shape == (B, S, N)
    ref_bf16 = _reference(s_ids, s_embeddings, all_embeddings, mob, jnp.bfloat16)
    assert jnp.allclose(p_sd, ref_bf16, atol=2e-4, rtol=2e-4), "bf16-path mismatch"

    # Full-f32 path matches the module's reference numerics tightly.
    p_sd_f32 = next_transition_prediction(
        s_ids, s_embeddings, all_embeddings, mob, compute_dtype=jnp.float32)
    p_sd_f32 = jax.block_until_ready(p_sd_f32)
    ref_f32 = _reference(s_ids, s_embeddings, all_embeddings, mob, jnp.float32)
    assert jnp.allclose(p_sd_f32, ref_f32, atol=1e-4, rtol=1e-4), "f32-path mismatch"

    print("KERNEL_OK")
</pallas_src>

<mosaic_0001>
module attributes {stable_mosaic.version = 11 : i64} {
  func.func @_ntp_kernel(%arg0: i32, %arg1: memref<16xi32, #tpu.memory_space<smem>>, %arg2: memref<16x32xbf16, #tpu.memory_space<vmem>>, %arg3: memref<32x128xbf16, #tpu.memory_space<vmem>>, %arg4: memref<64x128xf32, #tpu.memory_space<vmem>>, %arg5: memref<16x128xf32, #tpu.memory_space<vmem>>, %arg6: memref<16x128xf32, #tpu.memory_space<vmem>>) attributes {dimension_semantics = [#tpu.dimension_semantics<parallel>], iteration_bounds = array<i64: 1>, scalar_prefetch = 1 : i64, scratch_operands = 1 : i64, tpu.core_type = #tpu.core_type<tc>, window_params = [{transform_indices = @transform_0, window_bounds = array<i64: 16, 32>}, {pipeline_mode = #tpu.pipeline_mode<synchronous>, transform_indices = @transform_1, window_bounds = array<i64: 32, 128>}, {pipeline_mode = #tpu.pipeline_mode<synchronous>, transform_indices = @transform_2, window_bounds = array<i64: 64, 128>}, {transform_indices = @transform_3, window_bounds = array<i64: 16, 128>}]} {
    %c0_i32 = arith.constant 0 : i32
    %c16_i32 = arith.constant 16 : i32
    %0 = arith.addi %c0_i32, %c16_i32 : i32
    %c1_i32 = arith.constant 1 : i32
    scf.for %arg7 = %c0_i32 to %0 step %c1_i32  : i32 {
      %c16_i32_11 = arith.constant 16 : i32
      %22 = arith.muli %arg0, %c16_i32_11 : i32
      %23 = arith.addi %22, %arg7 : i32
      %24 = arith.index_cast %23 : i32 to index
      %25 = memref.load %arg1[%24] : memref<16xi32, #tpu.memory_space<smem>>
      %26 = arith.index_cast %25 : i32 to index
      %c0_12 = arith.constant 0 : index
      %27 = vector.load %arg4[%26, %c0_12] : memref<64x128xf32, #tpu.memory_space<vmem>>, vector<1x128xf32>
      %28 = arith.index_cast %arg7 : i32 to index
      %c0_13 = arith.constant 0 : index
      %29 = vector.load %arg6[%28, %c0_13] : memref<16x128xf32, #tpu.memory_space<vmem>>, vector<1x128xf32>
      tpu.vector_store %arg6[%28, %c0_13], %27 {strides = array<i32>} : memref<16x128xf32, #tpu.memory_space<vmem>>, vector<1x128xf32>,
    }
    %c16_i32_0 = arith.constant 16 : i32
    %c0 = arith.constant 0 : index
    %c0_1 = arith.constant 0 : index
    %1 = vector.load %arg2[%c0, %c0_1] : memref<16x32xbf16, #tpu.memory_space<vmem>>, vector<16x32xbf16>
    %c0_2 = arith.constant 0 : index
    %c0_3 = arith.constant 0 : index
    %2 = vector.load %arg3[%c0_2, %c0_3] : memref<32x128xbf16, #tpu.memory_space<vmem>>, vector<32x128xbf16>
    %cst = arith.constant dense<0.000000e+00> : vector<16x128xf32>
    %3 = tpu.matmul %1, %2, %cst {dimension_numbers = #tpu.dot_dimension_numbers<[1], [0], [0], [1], [0, 0, 1, 1], [], []>} : vector<16x32xbf16>, vector<32x128xbf16>, vector<16x128xf32> -> vector<16x128xf32>
    %4 = tpu.iota {dimensions = array<i32: 1>} : vector<16x128xi32>
    %c48_i32 = arith.constant 48 : i32
    %5 = vector.broadcast %c48_i32 : i32 to vector<16x128xi32>
    %6 = arith.cmpi slt, %4, %5 : vector<16x128xi32>
    %cst_4 = arith.constant -1.000000e+30 : f32
    %7 = vector.broadcast %cst_4 : f32 to vector<16x128xf32>
    %8 = arith.select %6, %3, %7 : vector<16x128xi1>, vector<16x128xf32>
    %cst_5 = arith.constant dense<0xFF800000> : vector<16xf32>
    %9 = vector.multi_reduction <maximumf>, %8, %cst_5 [1] : vector<16x128xf32> to vector<16xf32>
    %10 = vector.shape_cast %9 : vector<16xf32> to vector<16x1xf32>
    %11 = vector.broadcast %10 : vector<16x1xf32> to vector<16x128xf32>
    %12 = arith.subf %8, %11 : vector<16x128xf32>
    %13 = math.exp %12 : vector<16x128xf32>
    %cst_6 = arith.constant dense<0.000000e+00> : vector<16xf32>
    %14 = vector.multi_reduction <add>, %13, %cst_6 [1] : vector<16x128xf32> to vector<16xf32>
    %15 = vector.shape_cast %14 : vector<16xf32> to vector<16x1xf32>
    %16 = math.log %15 : vector<16x1xf32>
    %17 = vector.broadcast %16 : vector<16x1xf32> to vector<16x128xf32>
    %18 = arith.subf %12, %17 : vector<16x128xf32>
    %c0_7 = arith.constant 0 : index
    %c0_8 = arith.constant 0 : index
    %19 = vector.load %arg6[%c0_7, %c0_8] : memref<16x128xf32, #tpu.memory_space<vmem>>, vector<16x128xf32>
    %20 = arith.mulf %19, %18 : vector<16x128xf32>
    %c0_9 = arith.constant 0 : index
    %c0_10 = arith.constant 0 : index
    %21 = vector.load %arg5[%c0_9, %c0_10] : memref<16x128xf32, #tpu.memory_space<vmem>>, vector<16x128xf32>
    tpu.vector_store %arg5[%c0_9, %c0_10], %20 {strides = array<i32>} : memref<16x128xf32, #tpu.memory_space<vmem>>, vector<16x128xf32>,
    return
  }
  func.func @transform_0(%arg0: i32, %arg1: memref<16xi32, #tpu.memory_space<smem>>) -> (i32, i32) {
    %c0_i32 = arith.constant 0 : i32
    %c0_i32_0 = arith.constant 0 : i32
    return %arg0, %c0_i32 : i32, i32
  }
  func.func @transform_1(%arg0: i32, %arg1: memref<16xi32, #tpu.memory_space<smem>>) -> (i32, i32) {
    %c0_i32 = arith.constant 0 : i32
    %c0_i32_0 = arith.constant 0 : i32
    %c0_i32_1 = arith.constant 0 : i32
    return %c0_i32, %c0_i32_0 : i32, i32
  }
  func.func @transform_2(%arg0: i32, %arg1: memref<16xi32, #tpu.memory_space<smem>>) -> (i32, i32) {
    %c0_i32 = arith.constant 0 : i32
    %c0_i32_0 = arith.constant 0 : i32
    %c0_i32_1 = arith.constant 0 : i32
    return %c0_i32, %c0_i32_0 : i32, i32
  }
  func.func @transform_3(%arg0: i32, %arg1: memref<16xi32, #tpu.memory_space<smem>>) -> (i32, i32) {
    %c0_i32 = arith.constant 0 : i32
    %c0_i32_0 = arith.constant 0 : i32
    return %arg0, %c0_i32 : i32, i32
  }
}

</mosaic_0001>

<bundles_post_ra>
// kernel: tpu_custom_call.1
= control target key start
LH: loop header
LB: loop body
LE: loop exit
PB: predicated region body
PF: predicated region fallthrough
CT: control target
= control target key end

     0   :  { %s349_s18 = smov [#allocation4]   ;;  %s404_s0 = inlined_call_operand.hbm [shape: s32[16], index: 0, kind: input, shape index: {}]   ;;  %s405_s1 = inlined_call_operand.hbm [shape: bf16[16,32], index: 1, kind: input, shape index: {}]   ;;  %s406_s2 = inlined_call_operand.hbm [shape: bf16[32,128], index: 2, kind: input, shape index: {}]   ;;  %s407_s3 = inlined_call_operand.hbm [shape: f32[64,128], index: 3, kind: input, shape index: {}]   ;;  %s408_s4 = inlined_call_operand.hbm [shape: f32[16,128], index: 4, kind: output, shape index: {}]  }
   0x1   :  { %s10_s17 = sshll.u32 %s404_s0, 4  ;;  %s11_s17 = int_to_ptr.hbm [resolvable:$true] %s10_s17 }
   0x2   :  { %13 = dma.hbm_to_smem %s11_s17, 16, %s349_s18, [#allocation3] }
   0x3   :  { %337 = dma.done.wait [#allocation3], 16 }
   0x4   :  { %338 = vsyncadd [#allocation3], 4294967280 }
   0x5   :  { %16 = sfence }
   0x6   :  { %17 = vsyncpa [#allocation6], 0 }
   0x7   :  { %18 = vsyncpa [#allocation9], 0 }
   0x8   :  { %19 = vsyncpa [#allocation7], 0  ;;  %s37_s21 = sshll.u32 %s406_s2, 4  ;;  %s350_s22 = smov [#allocation8]   ;;  %s38_s21 = int_to_ptr.hbm [resolvable:$true] %s37_s21 }
   0x9   :  { %s39_s23 = sshll.u32 %s350_s22, 4  ;;  %s24_s0 = sshll.u32 %s405_s1, 4  ;;  %s40_s23 = int_to_ptr.vmem [resolvable:$true] %s39_s23  ;;  %s25_s0 = int_to_ptr.hbm [resolvable:$true] %s24_s0 }
   0xa   :  { %s351_s26 = smov 64   ;;  %s352_s27 = smov 4  }
   0xb   :  { %45 = dma.hbm_to_vmem [thread:$0]  %s38_s21, 256, %s40_s23, [#allocation9], %s351_s26, %s351_s26, %s352_s27  }
   0xc   :  { %s353_s28 = smov [#allocation5]   ;;  %s50_s6 = sshll.u32 %s407_s3, 4  ;;  %s51_s6 = int_to_ptr.hbm [resolvable:$true] %s50_s6 }
   0xd   :  { %s26_s29 = sshll.u32 %s353_s28, 4  ;;  %s354_s2 = smov [#allocation10]   ;;  %s27_s29 = int_to_ptr.vmem [resolvable:$true] %s26_s29 }
   0xe   :  { %32 = dma.hbm_to_vmem [thread:$0]  %s25_s0, 128, %s27_s29, [#allocation6], %s351_s26, %s351_s26, %s352_s27  }
   0xf   :  { %s52_s7 = sshll.u32 %s354_s2, 4  ;;  %s355_s8 = smov 128   ;;  %s53_s7 = int_to_ptr.vmem [resolvable:$true] %s52_s7 }
  0x10   :  { %s356_s9 = smov 8  }
  0x11   :  { %58 = dma.hbm_to_vmem [thread:$0]  %s51_s6, 1024, %s53_s7, [#allocation9], %s355_s8, %s355_s8, %s356_s9  }
  0x12   :  { %339 = dma.done.wait [#allocation6], 128  }
  0x13   :  { %340 = vsyncadd [#allocation6], 4294967168 }
  0x14   :  { %341 = dma.done.wait [#allocation9], 1280  }
  0x15   :  { %342 = vsyncadd [#allocation9], 4294966016  ;;  %s345_s1 = smov 0  }
  0x16 LB: > { %s80_s3 = sld [smem:[#allocation4 + %s347_s1]]  ;;  %s83_s11 = scalar_lea.vmem [#allocation2], %s347_s1  ;;  %s347_s1 = sphi %s345_s1, %s77_s1  }
  0x17   : > { %s77_s1 = sadd.s32 1, %s347_s1  }
  0x18   : > { %p74_p0 = scmp.ge.s32.totalorder %s77_s1, 16  }
  0x19   :  { %v199_v1 = vld [vmem:[#allocation8 + $0x8] sm:$0xff] (%p74_p0)  ;;  %v198_v2 = vld [vmem:[#allocation8] sm:$0xff] (%p74_p0)  ;;  %v197_v3 = vld [vmem:[#allocation5] sm:$0xff] (%p74_p0)  ;;  %vm108_vm0 = vcmask (%p74_p0), 261120   ;;  %v126_v4 = vlaneseq (%p74_p0)  ;;  %s357_s12 = smov (%p74_p0), [#allocation11]   ;;  %s163_s16 = sshll.u32 (%p74_p0), %s408_s4, 4  ;;  %s164_s16 = int_to_ptr.hbm [resolvable:$true] %s163_s16 }
  0x1a   :  { %76 = sbr.rel (!%p74_p0) target bundleno = 22 (0x16), region = 53  ;;  %118 = vmatpush.bf16.msra.mxu0 (%p74_p0), %v199_v1  ;;  %s161_s13 = sshll.u32 (%p74_p0), %s357_s12, 4  ;;  %s162_s13 = int_to_ptr.vmem [resolvable:$true] %s161_s13 }
  0x1b   :  { %v127_v5 = vand.u32 (%p74_p0), 127, %v126_v4 }
  0x1c   : > { %s81_s10 = scalar_lea.vmem [#allocation10], %s80_s3 }
  0x1d   : > { %v82_v0 = vld [vmem:[%s81_s10] sm:$0x1]  ;;  %vm128_vm1 = vcmp.lt.s32.totalorder (%p74_p0), %v127_v5, 48 }
  0x1e   : > { %84 = vst [vmem:[%s83_s11] sm:$0x1] %v82_v0  ;;  %119 = vmatpush.bf16.msra.mxu0 (%p74_p0), %v198_v2 }
  0x21   :  { %196 = vmatmul.msk.bf16.vlgmr.msra.gmra.mxu0 %vm108_vm0, %v197_v3 }
  0x25   :  { %v151_v22 = vld [vmem:[#allocation2] sm:$0xff]  ;;  %v152_v27 = vld [vmem:[#allocation2 + $0x8] sm:$0xff] }
  0x9e   :  { %v121_v6 = vpop.f32.mrf.mxu0 }
  0x9f   :  { %v129_v7 = vsel %vm128_vm1, %v121_v6, -1e+30 }
  0xa0   :  { %131 = vmax.xlane.f32.xlu0 %v129_v7 }
  0xa6   :  { %v123_v8 = vpop.f32.mrf.mxu0 }
  0xa7   :  { %v130_v9 = vsel %vm128_vm1, %v123_v8, -1e+30 }
  0xa8   :  { %133 = vmax.xlane.f32.xlu0 %v130_v9 }
 0x113   :  { %v132_v10 = vpop.xlane.xlu0 %131 }
 0x114   :  { %v135_v11 = vsub.f32 %v129_v7, %v132_v10 }
 0x116   :  { %v137_v12 = vmul.f32 1.442695, %v135_v11 }
 0x118   :  { %217 = vpow2.f32 %v137_v12 }
 0x11b   :  { %v134_v13 = vpop.xlane.xlu0 %133 }
 0x11c   :  { %v136_v14 = vsub.f32 %v130_v9, %v134_v13 }
 0x11e   :  { %v218_v15 = vpop.eup %217  ;;  %v139_v16 = vmul.f32 1.442695, %v136_v14 }
 0x11f   :  { %141 = vadd.xlane.f32.xlu1 %v218_v15 }
 0x120   :  { %219 = vpow2.f32 %v139_v16 }
 0x126   :  { %v220_v17 = vpop.eup %219 }
 0x127   :  { %143 = vadd.xlane.f32.xlu1 %v220_v17 }
 0x192   :  { %v142_v18 = vpop.xlane.xlu1 %141 }
 0x193   :  { %221 = vlog2.f32 %v142_v18 }
 0x199   :  { %v222_v19 = vpop.eup %221 }
 0x19a   :  { %v146_v20 = vmul.f32 0.6931472, %v222_v19  ;;  %v144_v21 = vpop.xlane.xlu1 %143 }
 0x19b   :  { %223 = vlog2.f32 %v144_v21 }
 0x19c   :  { %v149_v23 = vsub.f32 %v135_v11, %v146_v20 }
 0x19e   :  { %v153_v24 = vmul.f32 %v151_v22, %v149_v23 }
 0x1a0   :  { %155 = vst [vmem:[#allocation11] sm:$0xff] %v153_v24 }
 0x1a1   :  { %v224_v25 = vpop.eup %223 }
 0x1a2   :  { %v148_v26 = vmul.f32 0.6931472, %v224_v25 }
 0x1a4   :  { %v150_v28 = vsub.f32 %v136_v14, %v148_v26 }
 0x1a6   :  { %v154_v29 = vmul.f32 %v152_v27, %v150_v28 }
 0x1a8   :  { %156 = vst [vmem:[#allocation11 + $0x8] sm:$0xff] %v154_v29 }
 0x1a9   :  { %169 = dma.vmem_to_hbm [thread:$0]  %s162_s13, 256, %s164_s16, [#allocation7], %s355_s8, %s355_s8, %s356_s9  }
 0x1aa   :  { %343 = dma.done.wait [#allocation7], 256  }
 0x1ab   :  { %344 = vsyncadd [#allocation7], 4294967040 }
 0x1ac   :  { %174 = vsyncpa [#allocation6], 1 }
 0x1ad   :  { %175 = vsyncpa [#allocation9], 1 }
 0x1ae   :  { %176 = vsyncpa [#allocation7], 1 }

</bundles_post_ra>
